<compile_context>
chip_gen: v7x
topology: tpu7x:2x2x1
jax: 0.10.0
libtpu: 0.0.40
codegen_flags: <defaults>
</compile_context>

<pallas_src>
import math
from functools import partial

import jax
import jax.numpy as jnp
from jax.experimental import pallas as pl
from jax.experimental.pallas import tpu as pltpu

LN_EPS = 1e-6
NEG_INF = -1e9


def _gelu(x):
    # BERT GELU (tanh approximation), computed on the f32 accumulator.
    return 0.5 * x * (1.0 + jnp.tanh(math.sqrt(2.0 / math.pi) * (x + 0.044715 * x ** 3)))


def _tile(dim, pref):
    """Largest divisor of `dim` that is <= pref (never falls back to full dim)."""
    if dim <= pref:
        return dim
    for t in range(pref, 0, -1):
        if dim % t == 0:
            return t
    return dim


def _softmax_exp_dtype():
    """bf16 exp relieves the EUP slot on v6e/v7x; v5e and older lack bf16 EUP."""
    try:
        kind = jax.devices()[0].device_kind.lower()
    except Exception:
        return jnp.float32
    if any(tag in kind for tag in ("v2", "v3", "v4", "v5")):
        return jnp.float32
    return jnp.bfloat16


# ----------------------------- Linear (tiled matmul, fused LN/bias/GELU/residual) ---

def _linear_kernel(*refs, activation, n_k, has_residual, has_ln):
    x_ref, w_ref, b_ref = refs[0], refs[1], refs[2]
    i = 3
    if has_ln:
        g_ref, bb_ref = refs[i], refs[i + 1]
        i += 2
    r_ref = None
    if has_residual:
        r_ref = refs[i]
        i += 1
    o_ref = refs[i]
    acc_ref = refs[i + 1] if n_k > 1 else None

    x = x_ref[...]
    if has_ln:
        xf = x.astype(jnp.float32)
        mu = jnp.mean(xf, axis=-1, keepdims=True)
        var = jnp.mean(jnp.square(xf - mu), axis=-1, keepdims=True)
        xf = (xf - mu) * jax.lax.rsqrt(var + LN_EPS)
        x = (xf * g_ref[...] + bb_ref[...]).astype(jnp.bfloat16)
    else:
        x = x.astype(jnp.bfloat16)

    def epilogue(acc):
        y = acc + b_ref[...]
        if activation == "gelu":
            y = _gelu(y)
        if has_residual:
            y = y + r_ref[...].astype(jnp.float32)
        o_ref[...] = y.astype(o_ref.dtype)

    if n_k == 1:
        epilogue(jnp.dot(x, w_ref[...], preferred_element_type=jnp.float32))
    else:
        k = pl.program_id(2)

        @pl.when(k == 0)
        def _():
            acc_ref[...] = jnp.zeros_like(acc_ref)

        acc_ref[...] += jnp.dot(x, w_ref[...], preferred_element_type=jnp.float32)

        @pl.when(k == n_k - 1)
        def _():
            epilogue(acc_ref[...])


def linear(x2d, w, b, *, activation=None, residual=None, ln=None,
           out_dtype=jnp.bfloat16, tm=512, tn=512, tk=1024):
    """y = act(LN?(x) @ w + b) [+ residual].  bf16 MXU operands, f32 accumulation."""
    M, K = x2d.shape
    K2, N = w.shape
    assert K == K2
    TM, TN, TK = _tile(M, tm), _tile(N, tn), _tile(K, tk)
    if ln is not None:
        # LN fusion needs the whole row resident in one K tile.
        assert TK == K, "LayerNorm fusion requires TK == K"
    grid = (M // TM, N // TN, K // TK)
    n_k = grid[2]

    if w.dtype != jnp.bfloat16:
        w = w.astype(jnp.bfloat16)

    in_specs = [
        pl.BlockSpec((TM, TK), lambda i, j, k: (i, k)),
        pl.BlockSpec((TK, TN), lambda i, j, k: (k, j)),
        pl.BlockSpec((1, TN), lambda i, j, k: (0, j)),
    ]
    args = [x2d, w, b.reshape(1, N).astype(jnp.float32)]
    if ln is not None:
        g, beta = ln
        in_specs += [pl.BlockSpec((1, TK), lambda i, j, k: (0, k)),
                     pl.BlockSpec((1, TK), lambda i, j, k: (0, k))]
        args += [g.reshape(1, K).astype(jnp.float32),
                 beta.reshape(1, K).astype(jnp.float32)]
    if residual is not None:
        in_specs.append(pl.BlockSpec((TM, TN), lambda i, j, k: (i, j)))
        args.append(residual)

    scratch = [] if n_k == 1 else [pltpu.VMEM((TM, TN), jnp.float32)]

    return pl.pallas_call(
        partial(_linear_kernel, activation=activation, n_k=n_k,
                has_residual=residual is not None, has_ln=ln is not None),
        out_shape=jax.ShapeDtypeStruct((M, N), out_dtype),
        grid=grid,
        in_specs=in_specs,
        out_specs=pl.BlockSpec((TM, TN), lambda i, j, k: (i, j)),
        scratch_shapes=scratch,
        compiler_params=pltpu.CompilerParams(
            dimension_semantics=("parallel", "parallel", "arbitrary")),
    )(*args)


# ----------------------------- Flash attention (head-on-grid) -----------------------

def _flash_attn_kernel(q_ref, k_ref, v_ref, bias_ref, o_ref,
                       m_sc, l_sc, acc_sc, *, exp_dtype):
    ki = pl.program_id(3)

    @pl.when(ki == 0)
    def _():
        m_sc[...] = jnp.full_like(m_sc, -1e30)
        l_sc[...] = jnp.zeros_like(l_sc)
        acc_sc[...] = jnp.zeros_like(acc_sc)

    q = q_ref[...]        # (TQ, dH) bf16 (1/sqrt(dH) scale folded into Wq)
    k = k_ref[...]        # (TK, dH) bf16
    v = v_ref[...]        # (TK, dH) bf16

    # scores = q @ k^T  (contraction on head_dim)
    s = jax.lax.dot_general(q, k, (((1,), (1,)), ((), ())),
                            preferred_element_type=jnp.float32)     # (TQ, TK)
    s = s + bias_ref[...]                                           # (1, TK) key-mask bias

    m_prev = m_sc[...]                                              # (TQ, 1)
    m_new = jnp.maximum(m_prev, jnp.max(s, axis=-1, keepdims=True))
    alpha = jnp.exp(m_prev - m_new)
    p = jnp.exp((s - m_new).astype(exp_dtype))                      # bf16 exp on v6e/v7x
    l_sc[...] = alpha * l_sc[...] + jnp.sum(p, axis=-1, keepdims=True,
                                            dtype=jnp.float32)
    acc_sc[...] = alpha * acc_sc[...] + jnp.dot(
        p.astype(v.dtype), v, preferred_element_type=jnp.float32)
    m_sc[...] = m_new

    @pl.when(ki == pl.num_programs(3) - 1)
    def _():
        inv_l = pl.reciprocal(l_sc[...], approx=True)
        o_ref[...] = (acc_sc[...] * inv_l).astype(o_ref.dtype)


def flash_attention(qkv, mask_bias, *, tq=128, tk=256, exp_dtype=jnp.float32):
    """qkv: [3, B, nH, S, dH] bf16 (fused QKV, consumed in place via BlockSpec);
    mask_bias: [B, 1, S] f32 additive key-mask.  Returns [B, nH, S, dH] bf16."""
    three, B, nH, S, dH = qkv.shape
    assert three == 3
    TQ, TK = _tile(S, tq), _tile(S, tk)
    grid = (B, nH, S // TQ, S // TK)
    return pl.pallas_call(
        partial(_flash_attn_kernel, exp_dtype=exp_dtype),
        out_shape=jax.ShapeDtypeStruct((B, nH, S, dH), jnp.bfloat16),
        grid=grid,
        in_specs=[
            pl.BlockSpec((None, None, None, TQ, dH),
                         lambda b, h, qi, ki: (0, b, h, qi, 0)),
            pl.BlockSpec((None, None, None, TK, dH),
                         lambda b, h, qi, ki: (1, b, h, ki, 0)),
            pl.BlockSpec((None, None, None, TK, dH),
                         lambda b, h, qi, ki: (2, b, h, ki, 0)),
            pl.BlockSpec((None, 1, TK), lambda b, h, qi, ki: (b, 0, ki)),
        ],
        out_specs=pl.BlockSpec((None, None, TQ, dH),
                               lambda b, h, qi, ki: (b, h, qi, 0)),
        scratch_shapes=[
            pltpu.VMEM((TQ, 1), jnp.float32),    # m (running max)
            pltpu.VMEM((TQ, 1), jnp.float32),    # l (running denom)
            pltpu.VMEM((TQ, dH), jnp.float32),   # acc
        ],
        compiler_params=pltpu.CompilerParams(
            dimension_semantics=("parallel", "parallel", "parallel", "arbitrary")),
    )(qkv, qkv, qkv, mask_bias)


# ----------------------------- Params -----------------------------------------------

def sinusoidal_pos_embedding(max_len, d_model):
    position = jnp.arange(max_len, dtype=jnp.float32)[:, None]
    div_term = jnp.exp(jnp.arange(0, d_model, 2, dtype=jnp.float32)
                       * -(math.log(10000.0) / d_model))
    pe = jnp.zeros((max_len, d_model), jnp.float32)
    pe = pe.at[:, 0::2].set(jnp.sin(position * div_term))
    pe = pe.at[:, 1::2].set(jnp.cos(position * div_term))
    return pe


def init_params(key, vocab_size, hidden, num_layers, heads, max_len):
    ff = hidden * 4
    scale = 0.02
    keys = jax.random.split(key, 2 + num_layers)
    tok = scale * jax.random.normal(keys[0], (vocab_size, hidden), jnp.float32)
    tok = tok.at[0].set(0.0)      # padding_idx=0
    seg = scale * jax.random.normal(keys[1], (3, hidden), jnp.float32)
    seg = seg.at[0].set(0.0)      # padding_idx=0
    pos = sinusoidal_pos_embedding(max_len, hidden)

    def w(k, shape):
        return scale * jax.random.normal(k, shape, jnp.float32)

    layers = []
    for li in range(num_layers):
        lk = jax.random.split(keys[2 + li], 6)
        layers.append(dict(
            wq=w(lk[0], (hidden, hidden)), bq=jnp.zeros((hidden,), jnp.float32),
            wk=w(lk[1], (hidden, hidden)), bk=jnp.zeros((hidden,), jnp.float32),
            wv=w(lk[2], (hidden, hidden)), bv=jnp.zeros((hidden,), jnp.float32),
            wo=w(lk[3], (hidden, hidden)), bo=jnp.zeros((hidden,), jnp.float32),
            w1=w(lk[4], (hidden, ff)), b1=jnp.zeros((ff,), jnp.float32),
            w2=w(lk[5], (ff, hidden)), b2=jnp.zeros((hidden,), jnp.float32),
            ln1_g=jnp.ones((hidden,), jnp.float32), ln1_b=jnp.zeros((hidden,), jnp.float32),
            ln2_g=jnp.ones((hidden,), jnp.float32), ln2_b=jnp.zeros((hidden,), jnp.float32),
        ))
    return dict(tok_emb=tok, seg_emb=seg, pos_emb=pos, layers=layers)


def prepare_params(raw, *, hidden, heads):
    """One-time weight prep: fuse QKV, fold the 1/sqrt(dH) scale into Wq/bq,
    cast all matmul weights to bf16.  Done once, never on the forward path."""
    dH = hidden // heads
    scale = 1.0 / math.sqrt(dH)
    layers = []
    for lp in raw["layers"]:
        wqkv = jnp.concatenate([lp["wq"] * scale, lp["wk"], lp["wv"]],
                               axis=1).astype(jnp.bfloat16)
        bqkv = jnp.concatenate([lp["bq"] * scale, lp["bk"], lp["bv"]]).astype(jnp.float32)
        layers.append(dict(
            wqkv=wqkv, bqkv=bqkv,
            wo=lp["wo"].astype(jnp.bfloat16), bo=lp["bo"],
            w1=lp["w1"].astype(jnp.bfloat16), b1=lp["b1"],
            w2=lp["w2"].astype(jnp.bfloat16), b2=lp["b2"],
            ln1_g=lp["ln1_g"], ln1_b=lp["ln1_b"],
            ln2_g=lp["ln2_g"], ln2_b=lp["ln2_b"],
        ))
    return dict(tok_emb=raw["tok_emb"], seg_emb=raw["seg_emb"],
                pos_emb=raw["pos_emb"], layers=layers)


# ----------------------------- Forward -----------------------------------------------

def bert_forward(params, x_tokens, segment_info, *, hidden, heads,
                 exp_dtype=jnp.float32):
    B, S = x_tokens.shape
    H, nH = hidden, heads
    dH = H // nH
    M = B * S

    # Key-mask as an additive bias [B, 1, S] (no [B, S, S] materialization).
    mask_bias = jnp.where(x_tokens > 0, 0.0, NEG_INF).astype(jnp.float32).reshape(B, 1, S)

    # TODO(synk): token/segment embedding gathers stay in plain JAX (arbitrary-row
    # gather has no clean tiled Pallas pattern at these sizes); dropout = identity.
    tok = params["tok_emb"][x_tokens]                                # [B, S, H]
    seg = params["seg_emb"][segment_info]                            # [B, S, H]
    pos = params["pos_emb"][:S]                                      # [S, H]
    x2d = (tok + seg + pos[None, :, :]).astype(jnp.bfloat16).reshape(M, H)  # bf16 residual

    for lp in params["layers"]:
        # Sublayer 1 (pre-LN): x + Wo(attn(LN(x)))  --  LN fused into the QKV matmul.
        qkv = linear(x2d, lp["wqkv"], lp["bqkv"],
                     ln=(lp["ln1_g"], lp["ln1_b"]),
                     out_dtype=jnp.bfloat16)                         # [M, 3H] bf16
        qkv = jnp.transpose(qkv.reshape(B, S, 3, nH, dH),
                            (2, 0, 3, 1, 4))                         # [3, B, nH, S, dH]
        attn = flash_attention(qkv, mask_bias, exp_dtype=exp_dtype)  # [B, nH, S, dH]
        attn2d = jnp.transpose(attn, (0, 2, 1, 3)).reshape(M, H)     # [M, H] bf16
        x2d = linear(attn2d, lp["wo"], lp["bo"], residual=x2d,
                     out_dtype=jnp.bfloat16)                         # fused residual add

        # Sublayer 2 (pre-LN): x + W2(GELU(W1(LN(x))))  --  LN fused into W1 matmul.
        ff = linear(x2d, lp["w1"], lp["b1"],
                    ln=(lp["ln2_g"], lp["ln2_b"]),
                    activation="gelu", out_dtype=jnp.bfloat16)       # [M, 4H] bf16
        x2d = linear(ff, lp["w2"], lp["b2"], residual=x2d,
                     out_dtype=jnp.bfloat16)                         # fused residual add

    return x2d.reshape(B, S, H).astype(jnp.float32)


# ------------------------------- Main -------------------------------------------------

if __name__ == "__main__":
    vocab_size, hidden, num_layers, heads = 100, 32, 2, 4
    B, S = 2, 8

    raw = init_params(jax.random.PRNGKey(0), vocab_size, hidden,
                      num_layers, heads, max_len=S)
    params = prepare_params(raw, hidden=hidden, heads=heads)   # one-time weight prep

    kx, _ = jax.random.split(jax.random.PRNGKey(0))
    x = jax.random.randint(kx, (B, S), 1, vocab_size).astype(jnp.int32)
    x = x.at[:, -2:].set(0)  # some padding tokens to exercise the attention mask
    segment_info = jnp.concatenate(
        [jnp.ones((B, S // 2), jnp.int32), 2 * jnp.ones((B, S // 2), jnp.int32)],
        axis=1)

    fwd = jax.jit(partial(bert_forward, hidden=hidden, heads=heads,
                          exp_dtype=_softmax_exp_dtype()))
    out = fwd(params, x, segment_info)
    jax.block_until_ready(out)
    assert out.shape == (B, S, hidden)
    assert bool(jnp.all(jnp.isfinite(out)))
    print("KERNEL_OK")
</pallas_src>

<mosaic_0001>
module attributes {stable_mosaic.version = 11 : i64} {
  func.func @_linear_kernel(%arg0: i32, %arg1: i32, %arg2: i32, %arg3: memref<16x32xbf16, #tpu.memory_space<vmem>>, %arg4: memref<32x96xbf16, #tpu.memory_space<vmem>>, %arg5: memref<1x96xf32, #tpu.memory_space<vmem>>, %arg6: memref<1x32xf32, #tpu.memory_space<vmem>>, %arg7: memref<1x32xf32, #tpu.memory_space<vmem>>, %arg8: memref<16x96xbf16, #tpu.memory_space<vmem>>) attributes {dimension_semantics = [#tpu.dimension_semantics<parallel>, #tpu.dimension_semantics<parallel>, #tpu.dimension_semantics<arbitrary>], iteration_bounds = array<i64: 1, 1, 1>, scalar_prefetch = 0 : i64, scratch_operands = 0 : i64, tpu.core_type = #tpu.core_type<tc>, window_params = [{transform_indices = @transform_0, window_bounds = array<i64: 16, 32>}, {transform_indices = @transform_1, window_bounds = array<i64: 32, 96>}, {transform_indices = @transform_2, window_bounds = array<i64: 1, 96>}, {transform_indices = @transform_3, window_bounds = array<i64: 1, 32>}, {transform_indices = @transform_4, window_bounds = array<i64: 1, 32>}, {transform_indices = @transform_5, window_bounds = array<i64: 16, 96>}]} {
    %c0 = arith.constant 0 : index
    %c0_0 = arith.constant 0 : index
    %0 = vector.load %arg3[%c0, %c0_0] : memref<16x32xbf16, #tpu.memory_space<vmem>>, vector<16x32xbf16>
    %1 = arith.extf %0 : vector<16x32xbf16> to vector<16x32xf32>
    %cst = arith.constant dense<0.000000e+00> : vector<16xf32>
    %2 = vector.multi_reduction <add>, %1, %cst [1] : vector<16x32xf32> to vector<16xf32>
    %3 = vector.shape_cast %2 : vector<16xf32> to vector<16x1xf32>
    %cst_1 = arith.constant 3.200000e+01 : f32
    %4 = vector.broadcast %cst_1 : f32 to vector<16x1xf32>
    %5 = arith.divf %3, %4 : vector<16x1xf32>
    %6 = vector.broadcast %5 : vector<16x1xf32> to vector<16x32xf32>
    %7 = arith.subf %1, %6 : vector<16x32xf32>
    %8 = arith.mulf %7, %7 : vector<16x32xf32>
    %cst_2 = arith.constant dense<0.000000e+00> : vector<16xf32>
    %9 = vector.multi_reduction <add>, %8, %cst_2 [1] : vector<16x32xf32> to vector<16xf32>
    %10 = vector.shape_cast %9 : vector<16xf32> to vector<16x1xf32>
    %cst_3 = arith.constant 3.200000e+01 : f32
    %11 = vector.broadcast %cst_3 : f32 to vector<16x1xf32>
    %12 = arith.divf %10, %11 : vector<16x1xf32>
    %13 = vector.broadcast %5 : vector<16x1xf32> to vector<16x32xf32>
    %14 = arith.subf %1, %13 : vector<16x32xf32>
    %cst_4 = arith.constant 9.99999997E-7 : f32
    %15 = vector.broadcast %cst_4 : f32 to vector<16x1xf32>
    %16 = arith.addf %12, %15 : vector<16x1xf32>
    %17 = math.rsqrt %16 : vector<16x1xf32>
    %18 = vector.broadcast %17 : vector<16x1xf32> to vector<16x32xf32>
    %19 = arith.mulf %14, %18 : vector<16x32xf32>
    %c0_5 = arith.constant 0 : index
    %c0_6 = arith.constant 0 : index
    %20 = vector.load %arg6[%c0_5, %c0_6] : memref<1x32xf32, #tpu.memory_space<vmem>>, vector<1x32xf32>
    %21 = vector.broadcast %20 : vector<1x32xf32> to vector<16x32xf32>
    %22 = arith.mulf %19, %21 : vector<16x32xf32>
    %c0_7 = arith.constant 0 : index
    %c0_8 = arith.constant 0 : index
    %23 = vector.load %arg7[%c0_7, %c0_8] : memref<1x32xf32, #tpu.memory_space<vmem>>, vector<1x32xf32>
    %24 = vector.broadcast %23 : vector<1x32xf32> to vector<16x32xf32>
    %25 = arith.addf %22, %24 : vector<16x32xf32>
    %26 = arith.truncf %25 : vector<16x32xf32> to vector<16x32xbf16>
    %c0_9 = arith.constant 0 : index
    %c0_10 = arith.constant 0 : index
    %27 = vector.load %arg4[%c0_9, %c0_10] : memref<32x96xbf16, #tpu.memory_space<vmem>>, vector<32x96xbf16>
    %cst_11 = arith.constant dense<0.000000e+00> : vector<16x96xf32>
    %28 = tpu.matmul %26, %27, %cst_11 {dimension_numbers = #tpu.dot_dimension_numbers<[1], [0], [0], [1], [0, 0, 1, 1], [], []>} : vector<16x32xbf16>, vector<32x96xbf16>, vector<16x96xf32> -> vector<16x96xf32>
    %c0_12 = arith.constant 0 : index
    %c0_13 = arith.constant 0 : index
    %29 = vector.load %arg5[%c0_12, %c0_13] : memref<1x96xf32, #tpu.memory_space<vmem>>, vector<1x96xf32>
    %30 = vector.broadcast %29 : vector<1x96xf32> to vector<16x96xf32>
    %31 = arith.addf %28, %30 : vector<16x96xf32>
    %32 = arith.truncf %31 : vector<16x96xf32> to vector<16x96xbf16>
    %c0_14 = arith.constant 0 : index
    %c0_15 = arith.constant 0 : index
    %33 = vector.load %arg8[%c0_14, %c0_15] : memref<16x96xbf16, #tpu.memory_space<vmem>>, vector<16x96xbf16>
    tpu.vector_store %arg8[%c0_14, %c0_15], %32 {strides = array<i32>} : memref<16x96xbf16, #tpu.memory_space<vmem>>, vector<16x96xbf16>,
    return
  }
  func.func @transform_0(%arg0: i32, %arg1: i32, %arg2: i32) -> (i32, i32) {
    %c0_i32 = arith.constant 0 : i32
    return %arg0, %arg2 : i32, i32
  }
  func.func @transform_1(%arg0: i32, %arg1: i32, %arg2: i32) -> (i32, i32) {
    %c0_i32 = arith.constant 0 : i32
    return %arg2, %arg1 : i32, i32
  }
  func.func @transform_2(%arg0: i32, %arg1: i32, %arg2: i32) -> (i32, i32) {
    %c0_i32 = arith.constant 0 : i32
    %c0_i32_0 = arith.constant 0 : i32
    return %c0_i32, %arg1 : i32, i32
  }
  func.func @transform_3(%arg0: i32, %arg1: i32, %arg2: i32) -> (i32, i32) {
    %c0_i32 = arith.constant 0 : i32
    %c0_i32_0 = arith.constant 0 : i32
    return %c0_i32, %arg2 : i32, i32
  }
  func.func @transform_4(%arg0: i32, %arg1: i32, %arg2: i32) -> (i32, i32) {
    %c0_i32 = arith.constant 0 : i32
    %c0_i32_0 = arith.constant 0 : i32
    return %c0_i32, %arg2 : i32, i32
  }
  func.func @transform_5(%arg0: i32, %arg1: i32, %arg2: i32) -> (i32, i32) {
    %c0_i32 = arith.constant 0 : i32
    return %arg0, %arg1 : i32, i32
  }
}

module attributes {stable_mosaic.version = 11 : i64} {
  func.func @_flash_attn_kernel(%arg0: i32, %arg1: i32, %arg2: i32, %arg3: i32, %arg4: memref<1x1x1x8x8xbf16, #tpu.memory_space<vmem>>, %arg5: memref<1x1x1x8x8xbf16, #tpu.memory_space<vmem>>, %arg6: memref<1x1x1x8x8xbf16, #tpu.memory_space<vmem>>, %arg7: memref<1x1x8xf32, #tpu.memory_space<vmem>>, %arg8: memref<1x1x8x8xbf16, #tpu.memory_space<vmem>>, %arg9: memref<8x1xf32, #tpu.memory_space<vmem>>, %arg10: memref<8x1xf32, #tpu.memory_space<vmem>>, %arg11: memref<8x8xf32, #tpu.memory_space<vmem>>) attributes {dimension_semantics = [#tpu.dimension_semantics<parallel>, #tpu.dimension_semantics<parallel>, #tpu.dimension_semantics<parallel>, #tpu.dimension_semantics<arbitrary>], iteration_bounds = array<i64: 2, 4, 1, 1>, scalar_prefetch = 0 : i64, scratch_operands = 3 : i64, tpu.core_type = #tpu.core_type<tc>, window_params = [{transform_indices = @transform_0, window_bounds = array<i64: 1, 1, 1, 8, 8>}, {transform_indices = @transform_1, window_bounds = array<i64: 1, 1, 1, 8, 8>}, {transform_indices = @transform_2, window_bounds = array<i64: 1, 1, 1, 8, 8>}, {transform_indices = @transform_3, window_bounds = array<i64: 1, 1, 8>}, {transform_indices = @transform_4, window_bounds = array<i64: 1, 1, 8, 8>}]} {
    %c0_i32 = arith.constant 0 : i32
    %0 = arith.cmpi eq, %arg3, %c0_i32 : i32
    %1 = arith.extui %0 : i1 to i32
    %c0_i32_0 = arith.constant 0 : i32
    %2 = arith.cmpi ne, %1, %c0_i32_0 : i32
    scf.if %2 {
      %cst_35 = arith.constant -1.000000e+30 : f32
      %41 = vector.broadcast %cst_35 : f32 to vector<8x1xf32>
      %c0_36 = arith.constant 0 : index
      %c0_37 = arith.constant 0 : index
      %42 = vector.load %arg9[%c0_36, %c0_37] : memref<8x1xf32, #tpu.memory_space<vmem>>, vector<8x1xf32>
      tpu.vector_store %arg9[%c0_36, %c0_37], %41 {strides = array<i32>} : memref<8x1xf32, #tpu.memory_space<vmem>>, vector<8x1xf32>,
      %cst_38 = arith.constant 0.000000e+00 : f32
      %43 = vector.broadcast %cst_38 : f32 to vector<8x1xf32>
      %c0_39 = arith.constant 0 : index
      %c0_40 = arith.constant 0 : index
      %44 = vector.load %arg10[%c0_39, %c0_40] : memref<8x1xf32, #tpu.memory_space<vmem>>, vector<8x1xf32>
      tpu.vector_store %arg10[%c0_39, %c0_40], %43 {strides = array<i32>} : memref<8x1xf32, #tpu.memory_space<vmem>>, vector<8x1xf32>,
      %cst_41 = arith.constant 0.000000e+00 : f32
      %45 = vector.broadcast %cst_41 : f32 to vector<8x8xf32>
      %c0_42 = arith.constant 0 : index
      %c0_43 = arith.constant 0 : index
      %46 = vector.load %arg11[%c0_42, %c0_43] : memref<8x8xf32, #tpu.memory_space<vmem>>, vector<8x8xf32>
      tpu.vector_store %arg11[%c0_42, %c0_43], %45 {strides = array<i32>} : memref<8x8xf32, #tpu.memory_space<vmem>>, vector<8x8xf32>,
    } else {
    }
    %c0 = arith.constant 0 : index
    %c0_1 = arith.constant 0 : index
    %c0_2 = arith.constant 0 : index
    %c0_3 = arith.constant 0 : index
    %c0_4 = arith.constant 0 : index
    %3 = vector.load %arg4[%c0, %c0_1, %c0_2, %c0_3, %c0_4] : memref<1x1x1x8x8xbf16, #tpu.memory_space<vmem>>, vector<1x1x1x8x8xbf16>
    %4 = vector.shape_cast %3 : vector<1x1x1x8x8xbf16> to vector<8x8xbf16>
    %c0_5 = arith.constant 0 : index
    %c0_6 = arith.constant 0 : index
    %c0_7 = arith.constant 0 : index
    %c0_8 = arith.constant 0 : index
    %c0_9 = arith.constant 0 : index
    %5 = vector.load %arg5[%c0_5, %c0_6, %c0_7, %c0_8, %c0_9] : memref<1x1x1x8x8xbf16, #tpu.memory_space<vmem>>, vector<1x1x1x8x8xbf16>
    %6 = vector.shape_cast %5 : vector<1x1x1x8x8xbf16> to vector<8x8xbf16>
    %c0_10 = arith.constant 0 : index
    %c0_11 = arith.constant 0 : index
    %c0_12 = arith.constant 0 : index
    %c0_13 = arith.constant 0 : index
    %c0_14 = arith.constant 0 : index
    %7 = vector.load %arg6[%c0_10, %c0_11, %c0_12, %c0_13, %c0_14] : memref<1x1x1x8x8xbf16, #tpu.memory_space<vmem>>, vector<1x1x1x8x8xbf16>
    %8 = vector.shape_cast %7 : vector<1x1x1x8x8xbf16> to vector<8x8xbf16>
    %cst = arith.constant dense<0.000000e+00> : vector<8x8xf32>
    %9 = tpu.matmul %4, %6, %cst {dimension_numbers = #tpu.dot_dimension_numbers<[1], [1], [0], [0], [0, 0, 1, 0], [], []>} : vector<8x8xbf16>, vector<8x8xbf16>, vector<8x8xf32> -> vector<8x8xf32>
    %c0_15 = arith.constant 0 : index
    %c0_16 = arith.constant 0 : index
    %c0_17 = arith.constant 0 : index
    %10 = vector.load %arg7[%c0_15, %c0_16, %c0_17] : memref<1x1x8xf32, #tpu.memory_space<vmem>>, vector<1x1x8xf32>
    %11 = vector.shape_cast %10 : vector<1x1x8xf32> to vector<1x8xf32>
    %12 = vector.broadcast %11 : vector<1x8xf32> to vector<8x8xf32>
    %13 = arith.addf %9, %12 : vector<8x8xf32>
    %c0_18 = arith.constant 0 : index
    %c0_19 = arith.constant 0 : index
    %14 = vector.load %arg9[%c0_18, %c0_19] : memref<8x1xf32, #tpu.memory_space<vmem>>, vector<8x1xf32>
    %cst_20 = arith.constant dense<0xFF800000> : vector<8xf32>
    %15 = vector.multi_reduction <maximumf>, %13, %cst_20 [1] : vector<8x8xf32> to vector<8xf32>
    %16 = vector.shape_cast %15 : vector<8xf32> to vector<8x1xf32>
    %17 = arith.maximumf %14, %16 : vector<8x1xf32>
    %18 = arith.subf %14, %17 : vector<8x1xf32>
    %19 = math.exp %18 : vector<8x1xf32>
    %20 = vector.broadcast %17 : vector<8x1xf32> to vector<8x8xf32>
    %21 = arith.subf %13, %20 : vector<8x8xf32>
    %22 = arith.truncf %21 : vector<8x8xf32> to vector<8x8xbf16>
    %23 = math.exp %22 : vector<8x8xbf16>
    %c0_21 = arith.constant 0 : index
    %c0_22 = arith.constant 0 : index
    %24 = vector.load %arg10[%c0_21, %c0_22] : memref<8x1xf32, #tpu.memory_space<vmem>>, vector<8x1xf32>
    %25 = arith.mulf %19, %24 : vector<8x1xf32>
    %26 = arith.extf %23 : vector<8x8xbf16> to vector<8x8xf32>
    %cst_23 = arith.constant dense<0.000000e+00> : vector<8xf32>
    %27 = vector.multi_reduction <add>, %26, %cst_23 [1] : vector<8x8xf32> to vector<8xf32>
    %28 = vector.shape_cast %27 : vector<8xf32> to vector<8x1xf32>
    %29 = arith.addf %25, %28 : vector<8x1xf32>
    %c0_24 = arith.constant 0 : index
    %c0_25 = arith.constant 0 : index
    %30 = vector.load %arg10[%c0_24, %c0_25] : memref<8x1xf32, #tpu.memory_space<vmem>>, vector<8x1xf32>
    tpu.vector_store %arg10[%c0_24, %c0_25], %29 {strides = array<i32>} : memref<8x1xf32, #tpu.memory_space<vmem>>, vector<8x1xf32>,
    %c0_26 = arith.constant 0 : index
    %c0_27 = arith.constant 0 : index
    %31 = vector.load %arg11[%c0_26, %c0_27] : memref<8x8xf32, #tpu.memory_space<vmem>>, vector<8x8xf32>
    %32 = vector.broadcast %19 : vector<8x1xf32> to vector<8x8xf32>
    %33 = arith.mulf %32, %31 : vector<8x8xf32>
    %cst_28 = arith.constant dense<0.000000e+00> : vector<8x8xf32>
    %34 = tpu.matmul %23, %8, %cst_28 {dimension_numbers = #tpu.dot_dimension_numbers<[1], [0], [0], [1], [0, 0, 1, 1], [], []>} : vector<8x8xbf16>, vector<8x8xbf16>, vector<8x8xf32> -> vector<8x8xf32>
    %35 = arith.addf %33, %34 : vector<8x8xf32>
    %c0_29 = arith.constant 0 : index
    %c0_30 = arith.constant 0 : index
    %36 = vector.load %arg11[%c0_29, %c0_30] : memref<8x8xf32, #tpu.memory_space<vmem>>, vector<8x8xf32>
    tpu.vector_store %arg11[%c0_29, %c0_30], %35 {strides = array<i32>} : memref<8x8xf32, #tpu.memory_space<vmem>>, vector<8x8xf32>,
    %c0_31 = arith.constant 0 : index
    %c0_32 = arith.constant 0 : index
    %37 = vector.load %arg9[%c0_31, %c0_32] : memref<8x1xf32, #tpu.memory_space<vmem>>, vector<8x1xf32>
    tpu.vector_store %arg9[%c0_31, %c0_32], %17 {strides = array<i32>} : memref<8x1xf32, #tpu.memory_space<vmem>>, vector<8x1xf32>,
    %c0_i32_33 = arith.constant 0 : i32
    %38 = arith.cmpi eq, %arg3, %c0_i32_33 : i32
    %39 = arith.extui %38 : i1 to i32
    %c0_i32_34 = arith.constant 0 : i32
    %40 = arith.cmpi ne, %39, %c0_i32_34 : i32
    scf.if %40 {
      %c0_35 = arith.constant 0 : index
      %c0_36 = arith.constant 0 : index
      %41 = vector.load %arg10[%c0_35, %c0_36] : memref<8x1xf32, #tpu.memory_space<vmem>>, vector<8x1xf32>
      %42 = tpu.reciprocal %41 {approx = true} : vector<8x1xf32> -> vector<8x1xf32>
      %c0_37 = arith.constant 0 : index
      %c0_38 = arith.constant 0 : index
      %43 = vector.load %arg11[%c0_37, %c0_38] : memref<8x8xf32, #tpu.memory_space<vmem>>, vector<8x8xf32>
      %44 = vector.broadcast %42 : vector<8x1xf32> to vector<8x8xf32>
      %45 = arith.mulf %43, %44 : vector<8x8xf32>
      %46 = arith.truncf %45 : vector<8x8xf32> to vector<8x8xbf16>
      %c0_39 = arith.constant 0 : index
      %c0_40 = arith.constant 0 : index
      %c0_41 = arith.constant 0 : index
      %c0_42 = arith.constant 0 : index
      %47 = vector.load %arg8[%c0_39, %c0_40, %c0_41, %c0_42] : memref<1x1x8x8xbf16, #tpu.memory_space<vmem>>, vector<1x1x8x8xbf16>
      %48 = vector.shape_cast %47 : vector<1x1x8x8xbf16> to vector<8x8xbf16>
      %49 = vector.shape_cast %46 : vector<8x8xbf16> to vector<1x1x8x8xbf16>
      tpu.vector_store %arg8[%c0_39, %c0_40, %c0_41, %c0_42], %49 {strides = array<i32>} : memref<1x1x8x8xbf16, #tpu.memory_space<vmem>>, vector<1x1x8x8xbf16>,
    } else {
    }
    return
  }
  func.func @transform_0(%arg0: i32, %arg1: i32, %arg2: i32, %arg3: i32) -> (i32, i32, i32, i32, i32) {
    %c0_i32 = arith.constant 0 : i32
    %c0_i32_0 = arith.constant 0 : i32
    %c0_i32_1 = arith.constant 0 : i32
    return %c0_i32, %arg0, %arg1, %arg2, %c0_i32_0 : i32, i32, i32, i32, i32
  }
  func.func @transform_1(%arg0: i32, %arg1: i32, %arg2: i32, %arg3: i32) -> (i32, i32, i32, i32, i32) {
    %c1_i32 = arith.constant 1 : i32
    %c0_i32 = arith.constant 0 : i32
    %c0_i32_0 = arith.constant 0 : i32
    return %c1_i32, %arg0, %arg1, %arg3, %c0_i32 : i32, i32, i32, i32, i32
  }
  func.func @transform_2(%arg0: i32, %arg1: i32, %arg2: i32, %arg3: i32) -> (i32, i32, i32, i32, i32) {
    %c2_i32 = arith.constant 2 : i32
    %c0_i32 = arith.constant 0 : i32
    %c0_i32_0 = arith.constant 0 : i32
    return %c2_i32, %arg0, %arg1, %arg3, %c0_i32 : i32, i32, i32, i32, i32
  }
  func.func @transform_3(%arg0: i32, %arg1: i32, %arg2: i32, %arg3: i32) -> (i32, i32, i32) {
    %c0_i32 = arith.constant 0 : i32
    %c0_i32_0 = arith.constant 0 : i32
    return %arg0, %c0_i32, %arg3 : i32, i32, i32
  }
  func.func @transform_4(%arg0: i32, %arg1: i32, %arg2: i32, %arg3: i32) -> (i32, i32, i32, i32) {
    %c0_i32 = arith.constant 0 : i32
    %c0_i32_0 = arith.constant 0 : i32
    return %arg0, %arg1, %arg2, %c0_i32 : i32, i32, i32, i32
  }
}

module attributes {stable_mosaic.version = 11 : i64} {
  func.func @_linear_kernel(%arg0: i32, %arg1: i32, %arg2: i32, %arg3: memref<16x32xbf16, #tpu.memory_space<vmem>>, %arg4: memref<32x32xbf16, #tpu.memory_space<vmem>>, %arg5: memref<1x32xf32, #tpu.memory_space<vmem>>, %arg6: memref<16x32xbf16, #tpu.memory_space<vmem>>, %arg7: memref<16x32xbf16, #tpu.memory_space<vmem>>) attributes {dimension_semantics = [#tpu.dimension_semantics<parallel>, #tpu.dimension_semantics<parallel>, #tpu.dimension_semantics<arbitrary>], iteration_bounds = array<i64: 1, 1, 1>, scalar_prefetch = 0 : i64, scratch_operands = 0 : i64, tpu.core_type = #tpu.core_type<tc>, window_params = [{transform_indices = @transform_0, window_bounds = array<i64: 16, 32>}, {transform_indices = @transform_1, window_bounds = array<i64: 32, 32>}, {transform_indices = @transform_2, window_bounds = array<i64: 1, 32>}, {transform_indices = @transform_3, window_bounds = array<i64: 16, 32>}, {transform_indices = @transform_4, window_bounds = array<i64: 16, 32>}]} {
    %c0 = arith.constant 0 : index
    %c0_0 = arith.constant 0 : index
    %0 = vector.load %arg3[%c0, %c0_0] : memref<16x32xbf16, #tpu.memory_space<vmem>>, vector<16x32xbf16>
    %c0_1 = arith.constant 0 : index
    %c0_2 = arith.constant 0 : index
    %1 = vector.load %arg4[%c0_1, %c0_2] : memref<32x32xbf16, #tpu.memory_space<vmem>>, vector<32x32xbf16>
    %cst = arith.constant dense<0.000000e+00> : vector<16x32xf32>
    %2 = tpu.matmul %0, %1, %cst {dimension_numbers = #tpu.dot_dimension_numbers<[1], [0], [0], [1], [0, 0, 1, 1], [], []>} : vector<16x32xbf16>, vector<32x32xbf16>, vector<16x32xf32> -> vector<16x32xf32>
    %c0_3 = arith.constant 0 : index
    %c0_4 = arith.constant 0 : index
    %3 = vector.load %arg5[%c0_3, %c0_4] : memref<1x32xf32, #tpu.memory_space<vmem>>, vector<1x32xf32>
    %4 = vector.broadcast %3 : vector<1x32xf32> to vector<16x32xf32>
    %5 = arith.addf %2, %4 : vector<16x32xf32>
    %c0_5 = arith.constant 0 : index
    %c0_6 = arith.constant 0 : index
    %6 = vector.load %arg6[%c0_5, %c0_6] : memref<16x32xbf16, #tpu.memory_space<vmem>>, vector<16x32xbf16>
    %7 = arith.extf %6 : vector<16x32xbf16> to vector<16x32xf32>
    %8 = arith.addf %5, %7 : vector<16x32xf32>
    %9 = arith.truncf %8 : vector<16x32xf32> to vector<16x32xbf16>
    %c0_7 = arith.constant 0 : index
    %c0_8 = arith.constant 0 : index
    %10 = vector.load %arg7[%c0_7, %c0_8] : memref<16x32xbf16, #tpu.memory_space<vmem>>, vector<16x32xbf16>
    tpu.vector_store %arg7[%c0_7, %c0_8], %9 {strides = array<i32>} : memref<16x32xbf16, #tpu.memory_space<vmem>>, vector<16x32xbf16>,
    return
  }
  func.func @transform_0(%arg0: i32, %arg1: i32, %arg2: i32) -> (i32, i32) {
    %c0_i32 = arith.constant 0 : i32
    return %arg0, %arg2 : i32, i32
  }
  func.func @transform_1(%arg0: i32, %arg1: i32, %arg2: i32) -> (i32, i32) {
    %c0_i32 = arith.constant 0 : i32
    return %arg2, %arg1 : i32, i32
  }
  func.func @transform_2(%arg0: i32, %arg1: i32, %arg2: i32) -> (i32, i32) {
    %c0_i32 = arith.constant 0 : i32
    %c0_i32_0 = arith.constant 0 : i32
    return %c0_i32, %arg1 : i32, i32
  }
  func.func @transform_3(%arg0: i32, %arg1: i32, %arg2: i32) -> (i32, i32) {
    %c0_i32 = arith.constant 0 : i32
    return %arg0, %arg1 : i32, i32
  }
  func.func @transform_4(%arg0: i32, %arg1: i32, %arg2: i32) -> (i32, i32) {
    %c0_i32 = arith.constant 0 : i32
    return %arg0, %arg1 : i32, i32
  }
}

module attributes {stable_mosaic.version = 11 : i64} {
  func.func @_linear_kernel(%arg0: i32, %arg1: i32, %arg2: i32, %arg3: memref<16x32xbf16, #tpu.memory_space<vmem>>, %arg4: memref<32x128xbf16, #tpu.memory_space<vmem>>, %arg5: memref<1x128xf32, #tpu.memory_space<vmem>>, %arg6: memref<1x32xf32, #tpu.memory_space<vmem>>, %arg7: memref<1x32xf32, #tpu.memory_space<vmem>>, %arg8: memref<16x128xbf16, #tpu.memory_space<vmem>>) attributes {dimension_semantics = [#tpu.dimension_semantics<parallel>, #tpu.dimension_semantics<parallel>, #tpu.dimension_semantics<arbitrary>], iteration_bounds = array<i64: 1, 1, 1>, scalar_prefetch = 0 : i64, scratch_operands = 0 : i64, tpu.core_type = #tpu.core_type<tc>, window_params = [{transform_indices = @transform_0, window_bounds = array<i64: 16, 32>}, {transform_indices = @transform_1, window_bounds = array<i64: 32, 128>}, {transform_indices = @transform_2, window_bounds = array<i64: 1, 128>}, {transform_indices = @transform_3, window_bounds = array<i64: 1, 32>}, {transform_indices = @transform_4, window_bounds = array<i64: 1, 32>}, {transform_indices = @transform_5, window_bounds = array<i64: 16, 128>}]} {
    %c0 = arith.constant 0 : index
    %c0_0 = arith.constant 0 : index
    %0 = vector.load %arg3[%c0, %c0_0] : memref<16x32xbf16, #tpu.memory_space<vmem>>, vector<16x32xbf16>
    %1 = arith.extf %0 : vector<16x32xbf16> to vector<16x32xf32>
    %cst = arith.constant dense<0.000000e+00> : vector<16xf32>
    %2 = vector.multi_reduction <add>, %1, %cst [1] : vector<16x32xf32> to vector<16xf32>
    %3 = vector.shape_cast %2 : vector<16xf32> to vector<16x1xf32>
    %cst_1 = arith.constant 3.200000e+01 : f32
    %4 = vector.broadcast %cst_1 : f32 to vector<16x1xf32>
    %5 = arith.divf %3, %4 : vector<16x1xf32>
    %6 = vector.broadcast %5 : vector<16x1xf32> to vector<16x32xf32>
    %7 = arith.subf %1, %6 : vector<16x32xf32>
    %8 = arith.mulf %7, %7 : vector<16x32xf32>
    %cst_2 = arith.constant dense<0.000000e+00> : vector<16xf32>
    %9 = vector.multi_reduction <add>, %8, %cst_2 [1] : vector<16x32xf32> to vector<16xf32>
    %10 = vector.shape_cast %9 : vector<16xf32> to vector<16x1xf32>
    %cst_3 = arith.constant 3.200000e+01 : f32
    %11 = vector.broadcast %cst_3 : f32 to vector<16x1xf32>
    %12 = arith.divf %10, %11 : vector<16x1xf32>
    %13 = vector.broadcast %5 : vector<16x1xf32> to vector<16x32xf32>
    %14 = arith.subf %1, %13 : vector<16x32xf32>
    %cst_4 = arith.constant 9.99999997E-7 : f32
    %15 = vector.broadcast %cst_4 : f32 to vector<16x1xf32>
    %16 = arith.addf %12, %15 : vector<16x1xf32>
    %17 = math.rsqrt %16 : vector<16x1xf32>
    %18 = vector.broadcast %17 : vector<16x1xf32> to vector<16x32xf32>
    %19 = arith.mulf %14, %18 : vector<16x32xf32>
    %c0_5 = arith.constant 0 : index
    %c0_6 = arith.constant 0 : index
    %20 = vector.load %arg6[%c0_5, %c0_6] : memref<1x32xf32, #tpu.memory_space<vmem>>, vector<1x32xf32>
    %21 = vector.broadcast %20 : vector<1x32xf32> to vector<16x32xf32>
    %22 = arith.mulf %19, %21 : vector<16x32xf32>
    %c0_7 = arith.constant 0 : index
    %c0_8 = arith.constant 0 : index
    %23 = vector.load %arg7[%c0_7, %c0_8] : memref<1x32xf32, #tpu.memory_space<vmem>>, vector<1x32xf32>
    %24 = vector.broadcast %23 : vector<1x32xf32> to vector<16x32xf32>
    %25 = arith.addf %22, %24 : vector<16x32xf32>
    %26 = arith.truncf %25 : vector<16x32xf32> to vector<16x32xbf16>
    %c0_9 = arith.constant 0 : index
    %c0_10 = arith.constant 0 : index
    %27 = vector.load %arg4[%c0_9, %c0_10] : memref<32x128xbf16, #tpu.memory_space<vmem>>, vector<32x128xbf16>
    %cst_11 = arith.constant dense<0.000000e+00> : vector<16x128xf32>
    %28 = tpu.matmul %26, %27, %cst_11 {dimension_numbers = #tpu.dot_dimension_numbers<[1], [0], [0], [1], [0, 0, 1, 1], [], []>} : vector<16x32xbf16>, vector<32x128xbf16>, vector<16x128xf32> -> vector<16x128xf32>
    %c0_12 = arith.constant 0 : index
    %c0_13 = arith.constant 0 : index
    %29 = vector.load %arg5[%c0_12, %c0_13] : memref<1x128xf32, #tpu.memory_space<vmem>>, vector<1x128xf32>
    %30 = vector.broadcast %29 : vector<1x128xf32> to vector<16x128xf32>
    %31 = arith.addf %28, %30 : vector<16x128xf32>
    %cst_14 = arith.constant 5.000000e-01 : f32
    %32 = vector.broadcast %cst_14 : f32 to vector<16x128xf32>
    %33 = arith.mulf %32, %31 : vector<16x128xf32>
    %34 = arith.mulf %31, %31 : vector<16x128xf32>
    %35 = arith.mulf %31, %34 : vector<16x128xf32>
    %cst_15 = arith.constant 4.471500e-02 : f32
    %36 = vector.broadcast %cst_15 : f32 to vector<16x128xf32>
    %37 = arith.mulf %36, %35 : vector<16x128xf32>
    %38 = arith.addf %31, %37 : vector<16x128xf32>
    %cst_16 = arith.constant 0.797884583 : f32
    %39 = vector.broadcast %cst_16 : f32 to vector<16x128xf32>
    %40 = arith.mulf %39, %38 : vector<16x128xf32>
    %41 = math.tanh %40 : vector<16x128xf32>
    %cst_17 = arith.constant 1.000000e+00 : f32
    %42 = vector.broadcast %cst_17 : f32 to vector<16x128xf32>
    %43 = arith.addf %42, %41 : vector<16x128xf32>
    %44 = arith.mulf %33, %43 : vector<16x128xf32>
    %45 = arith.truncf %44 : vector<16x128xf32> to vector<16x128xbf16>
    %c0_18 = arith.constant 0 : index
    %c0_19 = arith.constant 0 : index
    %46 = vector.load %arg8[%c0_18, %c0_19] : memref<16x128xbf16, #tpu.memory_space<vmem>>, vector<16x128xbf16>
    tpu.vector_store %arg8[%c0_18, %c0_19], %45 {strides = array<i32>} : memref<16x128xbf16, #tpu.memory_space<vmem>>, vector<16x128xbf16>,
    return
  }
  func.func @transform_0(%arg0: i32, %arg1: i32, %arg2: i32) -> (i32, i32) {
    %c0_i32 = arith.constant 0 : i32
    return %arg0, %arg2 : i32, i32
  }
  func.func @transform_1(%arg0: i32, %arg1: i32, %arg2: i32) -> (i32, i32) {
    %c0_i32 = arith.constant 0 : i32
    return %arg2, %arg1 : i32, i32
  }
  func.func @transform_2(%arg0: i32, %arg1: i32, %arg2: i32) -> (i32, i32) {
    %c0_i32 = arith.constant 0 : i32
    %c0_i32_0 = arith.constant 0 : i32
    return %c0_i32, %arg1 : i32, i32
  }
  func.func @transform_3(%arg0: i32, %arg1: i32, %arg2: i32) -> (i32, i32) {
    %c0_i32 = arith.constant 0 : i32
    %c0_i32_0 = arith.constant 0 : i32
    return %c0_i32, %arg2 : i32, i32
  }
  func.func @transform_4(%arg0: i32, %arg1: i32, %arg2: i32) -> (i32, i32) {
    %c0_i32 = arith.constant 0 : i32
    %c0_i32_0 = arith.constant 0 : i32
    return %c0_i32, %arg2 : i32, i32
  }
  func.func @transform_5(%arg0: i32, %arg1: i32, %arg2: i32) -> (i32, i32) {
    %c0_i32 = arith.constant 0 : i32
    return %arg0, %arg1 : i32, i32
  }
}

module attributes {stable_mosaic.version = 11 : i64} {
  func.func @_linear_kernel(%arg0: i32, %arg1: i32, %arg2: i32, %arg3: memref<16x128xbf16, #tpu.memory_space<vmem>>, %arg4: memref<128x32xbf16, #tpu.memory_space<vmem>>, %arg5: memref<1x32xf32, #tpu.memory_space<vmem>>, %arg6: memref<16x32xbf16, #tpu.memory_space<vmem>>, %arg7: memref<16x32xbf16, #tpu.memory_space<vmem>>) attributes {dimension_semantics = [#tpu.dimension_semantics<parallel>, #tpu.dimension_semantics<parallel>, #tpu.dimension_semantics<arbitrary>], iteration_bounds = array<i64: 1, 1, 1>, scalar_prefetch = 0 : i64, scratch_operands = 0 : i64, tpu.core_type = #tpu.core_type<tc>, window_params = [{transform_indices = @transform_0, window_bounds = array<i64: 16, 128>}, {transform_indices = @transform_1, window_bounds = array<i64: 128, 32>}, {transform_indices = @transform_2, window_bounds = array<i64: 1, 32>}, {transform_indices = @transform_3, window_bounds = array<i64: 16, 32>}, {transform_indices = @transform_4, window_bounds = array<i64: 16, 32>}]} {
    %c0 = arith.constant 0 : index
    %c0_0 = arith.constant 0 : index
    %0 = vector.load %arg3[%c0, %c0_0] : memref<16x128xbf16, #tpu.memory_space<vmem>>, vector<16x128xbf16>
    %c0_1 = arith.constant 0 : index
    %c0_2 = arith.constant 0 : index
    %1 = vector.load %arg4[%c0_1, %c0_2] : memref<128x32xbf16, #tpu.memory_space<vmem>>, vector<128x32xbf16>
    %cst = arith.constant dense<0.000000e+00> : vector<16x32xf32>
    %2 = tpu.matmul %0, %1, %cst {dimension_numbers = #tpu.dot_dimension_numbers<[1], [0], [0], [1], [0, 0, 1, 1], [], []>} : vector<16x128xbf16>, vector<128x32xbf16>, vector<16x32xf32> -> vector<16x32xf32>
    %c0_3 = arith.constant 0 : index
    %c0_4 = arith.constant 0 : index
    %3 = vector.load %arg5[%c0_3, %c0_4] : memref<1x32xf32, #tpu.memory_space<vmem>>, vector<1x32xf32>
    %4 = vector.broadcast %3 : vector<1x32xf32> to vector<16x32xf32>
    %5 = arith.addf %2, %4 : vector<16x32xf32>
    %c0_5 = arith.constant 0 : index
    %c0_6 = arith.constant 0 : index
    %6 = vector.load %arg6[%c0_5, %c0_6] : memref<16x32xbf16, #tpu.memory_space<vmem>>, vector<16x32xbf16>
    %7 = arith.extf %6 : vector<16x32xbf16> to vector<16x32xf32>
    %8 = arith.addf %5, %7 : vector<16x32xf32>
    %9 = arith.truncf %8 : vector<16x32xf32> to vector<16x32xbf16>
    %c0_7 = arith.constant 0 : index
    %c0_8 = arith.constant 0 : index
    %10 = vector.load %arg7[%c0_7, %c0_8] : memref<16x32xbf16, #tpu.memory_space<vmem>>, vector<16x32xbf16>
    tpu.vector_store %arg7[%c0_7, %c0_8], %9 {strides = array<i32>} : memref<16x32xbf16, #tpu.memory_space<vmem>>, vector<16x32xbf16>,
    return
  }
  func.func @transform_0(%arg0: i32, %arg1: i32, %arg2: i32) -> (i32, i32) {
    %c0_i32 = arith.constant 0 : i32
    return %arg0, %arg2 : i32, i32
  }
  func.func @transform_1(%arg0: i32, %arg1: i32, %arg2: i32) -> (i32, i32) {
    %c0_i32 = arith.constant 0 : i32
    return %arg2, %arg1 : i32, i32
  }
  func.func @transform_2(%arg0: i32, %arg1: i32, %arg2: i32) -> (i32, i32) {
    %c0_i32 = arith.constant 0 : i32
    %c0_i32_0 = arith.constant 0 : i32
    return %c0_i32, %arg1 : i32, i32
  }
  func.func @transform_3(%arg0: i32, %arg1: i32, %arg2: i32) -> (i32, i32) {
    %c0_i32 = arith.constant 0 : i32
    return %arg0, %arg1 : i32, i32
  }
  func.func @transform_4(%arg0: i32, %arg1: i32, %arg2: i32) -> (i32, i32) {
    %c0_i32 = arith.constant 0 : i32
    return %arg0, %arg1 : i32, i32
  }
}

</mosaic_0001>

<bundles_post_ra>
// kernel: bert_forward.12
= control target key start
LH: loop header
LB: loop body
LE: loop exit
PB: predicated region body
PF: predicated region fallthrough
CT: control target
= control target key end

     0   :  { %v143_v0 = vmov 0.0   ;;  %vm144_vm0 = vmmov 0   ;;  %vm48_vm1 = vcmask 261120   ;;  %vm107_vm2 = vcmask 257024   ;;  %s191_s1 = inlined_call_operand.vmem [shape: bf16[32,32], index: 1, kind: input, shape index: {}]   ;;  %s192_s0 = inlined_call_operand.vmem [shape: bf16[16,32], index: 0, kind: input, shape index: {}]   ;;  %s193_s3 = inlined_call_operand.vmem [shape: bf16[16,32], index: 3, kind: input, shape index: {}]   ;;  %s194_s2 = inlined_call_operand.vmem [shape: f32[1,32], index: 2, kind: input, shape index: {}]   ;;  %s195_s4 = inlined_call_operand.vmem [shape: bf16[16,32], index: 4, kind: output, shape index: {}]  }
   0x1   :  { %130 = vmatprep.subr.bf16.mxu0 %v143_v0  ;;  %v140_v1 = vld [vmem:[%s191_s1] sm:$0xff]   ;;  %134 = vmatprep.mubr.msk.bf16.mxu0 %vm144_vm0, %v143_v0  ;;  %v141_v2 = vld [vmem:[%s191_s1 + $0x8] sm:$0xff]  }
   0x2   :  { %131 = vmatpush3.bf16.msra.mxu0 %v140_v1  ;;  %v142_v3 = vld [vmem:[%s192_s0] sm:$0xff]  }
   0x3   :  { %132 = vmatprep.subr.bf16.mxu0 %v143_v0  ;;  %v124_v4 = vld [vmem:[%s193_s3] sm:$0xff]  }
   0x4   :  { %v114_v5 = vld [vmem:[%s194_s2] ss:$0 sm:$0xff]  ;;  %v125_v6 = vunpack.c.l.bf16 %v124_v4  ;;  %v126_v10 = vunpack.c.h.bf16 %v124_v4 }
   0x6   :  { %133 = vmatpush3.bf16.msra.mxu0 %v141_v2 }
   0x9   :  { %135 = vmatmul.mubr.msk.bf16.vlgmr.msra.gmra.mrb[0].mxu0 %vm48_vm1, %v142_v3 }
  0xdc   :  { %v86_v7 = vpop.f32.mrb[0].mxu0 }
  0xdd   :  { %v87_v8 = vadd.f32 %v114_v5, %v86_v7  ;;  %v136_v9 = vpop.f32.mrb[1].mxu0 }
  0xde   :  { %v89_v11 = vpop.f32.mrb[2].mxu0 }
  0xdf   :  { %v97_v12 = vadd.f32 %v125_v6, %v87_v8  ;;  %v90_v13 = vadd.f32 %v114_v5, %v89_v11  ;;  %v137_v14 = vpop.f32.mrb[3].mxu0 }
  0xe1   :  { %v121_v15 = vpack.c.bf16 %v97_v12, %v97_v12  ;;  %v98_v16 = vadd.f32 %v126_v10, %v90_v13 }
  0xe3   :  { %108 = vst.msk [vmem:[%s195_s4] sm:$0xf] %vm107_vm2, %v121_v15  ;;  %v122_v17 = vpack.c.bf16 %v98_v16, %v98_v16 }
  0xe5   :  { %109 = vst.msk [vmem:[%s195_s4 + $0x4] sm:$0xf] %vm107_vm2, %v122_v17 }

// kernel: bert_forward.10
= control target key start
LH: loop header
LB: loop body
LE: loop exit
PB: predicated region body
PF: predicated region fallthrough
CT: control target
= control target key end

     0   :  { %vm25_vm0 = vcmask 261120   ;;  %v187_v16 = vmov 0.0   ;;  %vm188_vm1 = vmmov 0   ;;  %vm147_vm2 = vcmask 781312   ;;  %s248_s0 = inlined_call_operand.vmem [shape: bf16[16,32], index: 0, kind: input, shape index: {}]   ;;  %s249_s1 = inlined_call_operand.vmem [shape: bf16[32,96], index: 1, kind: input, shape index: {}]   ;;  %s250_s3 = inlined_call_operand.vmem [shape: f32[1,32], index: 3, kind: input, shape index: {}]   ;;  %s251_s4 = inlined_call_operand.vmem [shape: f32[1,32], index: 4, kind: input, shape index: {}]   ;;  %s252_s2 = inlined_call_operand.vmem [shape: f32[1,96], index: 2, kind: input, shape index: {}]   ;;  %s253_s5 = inlined_call_operand.vmem [shape: bf16[16,96], index: 5, kind: output, shape index: {}]  }
   0x1   :  { %v165_v0 = vld [vmem:[%s248_s0] sm:$0xff]   ;;  %171 = vmatprep.subr.bf16.mxu0 %v187_v16  ;;  %v182_v17 = vld [vmem:[%s249_s1 + $0x8] sm:$0xff]   ;;  %175 = vmatprep.mubr.msk.bf16.mxu0 %vm188_vm1, %v187_v16 }
   0x2   :  { %v166_v1 = vunpack.c.l.bf16 %v165_v0  ;;  %v167_v2 = vunpack.c.h.bf16 %v165_v0  ;;  %v181_v15 = vld [vmem:[%s249_s1] sm:$0xff]  }
   0x3   :  { %172 = vmatpush3.bf16.msra.mxu0 %v181_v15  ;;  %v154_v26 = vld [vmem:[%s250_s3] ss:$0 sm:$0xff] }
   0x4   :  { %v26_v3 = vsel %vm25_vm0, %v166_v1, 0.0  ;;  %v29_v4 = vsel %vm25_vm0, %v167_v2, 0.0  ;;  %173 = vmatprep.subr.bf16.mxu0 %v187_v16  ;;  %v155_v30 = vld [vmem:[%s251_s4] ss:$0 sm:$0xff] }
   0x5   :  { %27 = vadd.xlane.f32.xlu0 %v26_v3  ;;  %v156_v35 = vld [vmem:[%s252_s2] ss:$0 sm:$0xff] }
   0x7   :  { %174 = vmatpush3.bf16.msra.mxu0 %v182_v17 }
   0x9   :  { %30 = vadd.xlane.f32.xlu0 %v29_v4 }
  0x92   :  { %v28_v5 = vpop.xlane.xlu0 %27 }
  0x93   :  { %v33_v6 = vmul.f32 0.03125, %v28_v5 }
  0x95   :  { %v35_v7 = vsub.f32 %v166_v1, %v33_v6 }
  0x96   :  { %v31_v8 = vpop.xlane.xlu0 %30 }
  0x97   :  { %v34_v9 = vmul.f32 0.03125, %v31_v8  ;;  %v37_v10 = vmul.f32 %v35_v7, %v35_v7 }
  0x99   :  { %v36_v11 = vsub.f32 %v167_v2, %v34_v9  ;;  %v39_v12 = vsel %vm25_vm0, %v37_v10, 0.0 }
  0x9a   :  { %40 = vadd.xlane.f32.xlu1 %v39_v12 }
  0x9b   :  { %v38_v13 = vmul.f32 %v36_v11, %v36_v11 }
  0x9d   :  { %v42_v14 = vsel %vm25_vm0, %v38_v13, 0.0 }
  0x9e   :  { %43 = vadd.xlane.f32.xlu1 %v42_v14 }
 0x127   :  { %v41_v18 = vpop.xlane.xlu1 %40 }
 0x128   :  { %v45_v19 = vmul.f32 0.03125, %v41_v18 }
 0x12a   :  { %v47_v20 = vadd.f32 1e-06, %v45_v19 }
 0x12b   :  { %v44_v21 = vpop.xlane.xlu1 %43 }
 0x12c   :  { %183 = vrsqrt.f32 %v47_v20  ;;  %v46_v22 = vmul.f32 0.03125, %v44_v21 }
 0x12e   :  { %v48_v23 = vadd.f32 1e-06, %v46_v22 }
 0x130   :  { %185 = vrsqrt.f32 %v48_v23 }
 0x136   :  { %v184_v24 = vpop.eup %183 }
 0x137   :  { %v51_v25 = vmul.f32 %v184_v24, %v35_v7 }
 0x139   :  { %v60_v29 = vmul.f32 %v154_v26, %v51_v25 }
 0x13a   :  { %v186_v27 = vpop.eup %185 }
 0x13b   :  { %v52_v28 = vmul.f32 %v186_v27, %v36_v11  ;;  %v69_v32 = vadd.f32 %v155_v30, %v60_v29 }
 0x13d   :  { %v61_v31 = vmul.f32 %v154_v26, %v52_v28 }
 0x13f   :  { %v70_v33 = vadd.f32 %v155_v30, %v61_v31 }
 0x141   :  { %v71_v34 = vpack.c.bf16 %v70_v33, %v69_v32 }
 0x143   :  { %176 = vmatmul.mubr.msk.bf16.vlgmr.msra.gmra.mrb[0].mxu0 %vm25_vm0, %v71_v34 }
 0x216   :  { %v132_v36 = vpop.f32.mrb[0].mxu0 }
 0x217   :  { %v133_v37 = vadd.f32 %v156_v35, %v132_v36  ;;  %v177_v38 = vpop.f32.mrb[1].mxu0 }
 0x218   :  { %v135_v39 = vpop.f32.mrb[2].mxu0 }
 0x219   :  { %v162_v40 = vpack.c.bf16 %v133_v37, %v133_v37  ;;  %v136_v41 = vadd.f32 %v156_v35, %v135_v39  ;;  %v178_v42 = vpop.f32.mrb[3].mxu0 }
 0x21b   :  { %148 = vst.msk [vmem:[%s253_s5] sm:$0xf] %vm147_vm2, %v162_v40  ;;  %v163_v43 = vpack.c.bf16 %v136_v41, %v136_v41 }
 0x21d   :  { %149 = vst.msk [vmem:[%s253_s5 + $0x4] sm:$0xf] %vm147_vm2, %v163_v43 }

// kernel: bert_forward.11
= control target key start
LH: loop header
LB: loop body
LE: loop exit
PB: predicated region body
PF: predicated region fallthrough
CT: control target
= control target key end

     0   :  { %s865_s15 = smov 0   ;;  %s867_s16 = smov 0   ;;  %s942_s0 = inlined_call_operand.vmem [shape: bf16[3,2,4,8,8], index: 0, kind: input, shape index: {}, may-alias: {0,1,2}]   ;;  %s943_s1 = inlined_call_operand.vmem [shape: bf16[3,2,4,8,8], index: 1, kind: input, shape index: {}, may-alias: {0,1,2}]   ;;  %s944_s2 = inlined_call_operand.vmem [shape: bf16[3,2,4,8,8], index: 2, kind: input, shape index: {}, may-alias: {0,1,2}]   ;;  %s945_s3 = inlined_call_operand.vmem [shape: f32[2,1,8], index: 3, kind: input, shape index: {}]   ;;  %s946_s4 = inlined_call_operand.vmem [shape: bf16[2,4,8,8], index: 4, kind: output, shape index: {}]  }
   0x1   :  { %s869_s17 = smov 0   ;;  %s871_s18 = smov 0  }
   0x2   :  { %s873_s19 = smov 0  }
   0x3 LB: > { %s36_s20 = sadd.s32 1, %s826_s17  ;;  %s40_s21 = sadd.s32 1, %s830_s18  ;;  %s834_s19 = sphi %s873_s19, %s14_s19   ;;  %s830_s18 = sphi %s871_s18, %s950_s18   ;;  %s826_s17 = sphi %s869_s17, %s949_s17   ;;  %s822_s16 = sphi %s867_s16, %s948_s16   ;;  %s818_s15 = sphi %s865_s15, %s947_s15  }
   0x4   : > { %p38_p0 = scmp.ge.s32.totalorder %s36_s20, 4  ;;  %p712_p1 = scmp.ge.s32.totalorder %s834_s19, 1 }
   0x5   : > { %p257_p2 = scmp.lt.s32.totalorder %s834_s19, 9 }
   0x6   : > { %s952_s20 = smov (%p38_p0, %s36_s20), 0  ;;  %s954_s21 = smov (!%p38_p0, %s40_s21), %s830_s18 }
   0x7   : > { %p258_p3 = pnand %p712_p1, %p257_p2  ;;  %p42_p4 = scmp.ge.s32.totalorder %s954_s21, 2 }
   0x8   : > { %p325_p5 = scmp.lt.s32.totalorder (!%p258_p3), %s822_s16, 1  ;;  %p327_p6 = scmp.lt.s32.totalorder (!%p258_p3), %s818_s15, 3  ;;  %vm385_vm0 = vcmask (!%p258_p3), 64512   ;;  %v836_v0 = vmov (!%p258_p3), 0.0   ;;  %vm837_vm1 = vmmov (!%p258_p3), 0   ;;  %vm382_vm2 = vcmask (!%p258_p3), 7168  }
   0x9   : > { %s956_s21 = smov (%p42_p4, %s954_s21), 0  ;;  %261 = sbr.rel (%p258_p3) target bundleno = 834 (0x342), region = 36 }
   0xa   : > { %732 = vmatprep.subr.bf16.mxu0 (!%p258_p3), %v836_v0  ;;  %386 = vst.msk [vmem:[#allocation4] sm:$0xff] (!%p258_p3), %vm385_vm0, %v836_v0  ;;  %734 = vmatprep.mubr.msk.bf16.mxu0 (!%p258_p3), %vm837_vm1, %v836_v0  ;;  %v838_v4 = vmov (!%p258_p3), -1e+30   ;;  %v839_v12 = vmov (!%p258_p3), 0   ;;  %vm481_vm3 = vcmask (!%p258_p3), 1043456   ;;  %vm541_vm4 = vcmask (!%p258_p3), 60416  }
   0xb   : > { %738 = vmatprep.subr.bf16.mxu1 (!%p258_p3), %v836_v0  ;;  %740 = vmatprep.mubr.msk.bf16.mxu1 (!%p258_p3), %vm837_vm1, %v836_v0  ;;  %383 = vst.msk [vmem:[#allocation2] sm:$0xff] (!%p258_p3), %vm382_vm2, %v838_v4  ;;  %384 = vst.msk [vmem:[#allocation3] sm:$0xff] (!%p258_p3), %vm382_vm2, %v836_v0 }
   0xc   : > { %788 = vset.pattern.permute.xlu0 (!%p258_p3), %v839_v12  ;;  %789 = vset.pattern.permute.xlu1 (!%p258_p3), %v839_v12 }
  0x10   : > { %s958_s16 = smov (!%p325_p5, %s822_s16), 1  ;;  %s960_s15 = smov (!%p327_p6, %s818_s15), 3 }
  0x11   : > { %s713_s22 = sshll.u32 %s958_s16, 2  ;;  %s365_s7 = scalar_lea.vmem %s945_s3, %s958_s16  ;;  %v471_v34 = vld [vmem:[#allocation4] sm:$0xff] }
  0x12   : > { %s333_s23 = sadd.s32 %s713_s22, %s960_s15  ;;  %v723_v5 = vld [vmem:[%s365_s7] ss:$0 sm:$0xff]  ;;  %v462_v28 = vld [vmem:[#allocation3] sm:$0xff] }
  0x13   : > { %s896_s24 = sshll.u32 %s333_s23, 2  ;;  %v444_v13 = vld [vmem:[#allocation2] sm:$0xff] }
  0x14   : > { %s628_s27 = scalar_lea.vmem %s943_s1, %s896_s24  ;;  %s335_s30 = scalar_lea.vmem %s942_s0, %s896_s24 }
  0x15   : > { %v721_v1 = vld [vmem:[%s628_s27 + $0x20] sm:$0xf]  ;;  %s634_s10 = scalar_lea.vmem %s944_s2, %s896_s24  ;;  %s376_s13 = scalar_lea.vmem %s946_s4, %s896_s24 }
  0x16   : > { %v402_v2 = vsel %vm385_vm0, %v721_v1, 0  ;;  %v387_v3 = vld [vmem:[%s335_s30] sm:$0xf] }
  0x17   : > { %733 = vmatpush3.bf16.xpose.msra.mxu0 %v402_v2  ;;  %v722_v17 = vld [vmem:[%s634_s10 + $0x40] sm:$0xf] }
  0x18   : > { %v483_v18 = vsel %vm481_vm3, %v722_v17, 0 }
  0x19   : > { %739 = vmatpush3.bf16.msra.mxu1 %v483_v18 }
  0x1e   : > { %735 = vmatmul.mubr.msk.bf16.vlgmr.msra.gmra.mrb[0].mxu0 %vm385_vm0, %v387_v3 }
  0xf1   : > { %v438_v6 = vpop.f32.mrb[0].mxu0 }
  0xf2   : > { %v439_v7 = vadd.f32 %v723_v5, %v438_v6  ;;  %v736_v8 = vpop.f32.mrb[1].mxu0 }
  0xf3   : > { %v441_v9 = vpop.f32.mrb[2].mxu0 }
  0xf4   : > { %v737_v10 = vpop.f32.mrb[3].mxu0  ;;  %v445_v11 = vsel %vm385_vm0, %v439_v7, -inf }
  0xf5   : > { %446 = vmax.xlane.f32.xlu0 %v445_v11 }
 0x182   : > { %v447_v14 = vpop.xlane.xlu0 %446 }
 0x183   : > { %v448_v15 = vmax.f32 %v444_v13, %v447_v14 }
 0x185   : > { %v449_v16 = vsub.f32 %v444_v13, %v448_v15  ;;  %527 = vst.msk [vmem:[#allocation2] sm:$0xff] %vm382_vm2, %v448_v15  ;;  %454 = vperm.xlu0 %788, %v448_v15  }
 0x187   : > { %v450_v26 = vmul.f32 1.442695, %v449_v16 }
 0x204   : > { %v455_v19 = vpop.permute.xlu0 %454 }
 0x205   : > { %v457_v20 = vsub.f32 %v439_v7, %v455_v19 }
 0x207   : > { %v458_v21 = vpack.c.bf16 %v457_v20, %v457_v20 }
 0x209   : > { %v460_v22 = vmul.bf16 1069105081, %v458_v21 }
 0x20b   : > { %790 = vpow.bf16 %v460_v22 }
 0x20c   : > { %792 = vpow2.f32 %v450_v26 }
 0x216   : > { %v791_v23 = vpop.eup %790 }
 0x217   : > { %741 = vmatmul.mubr.msk.bf16.vlgmr.msra.gmra.mrb[0].mxu1 %vm385_vm0, %v791_v23  ;;  %v464_v24 = vunpack.c.l.bf16 %v791_v23  ;;  %v793_v27 = vpop.eup %792 }
 0x218   : > { %v463_v29 = vmul.f32 %v793_v27, %v462_v28 }
 0x219   : > { %v465_v25 = vsel %vm385_vm0, %v464_v24, 0.0 }
 0x21a   : > { %466 = vadd.xlane.f32.xlu1 %v465_v25 }
 0x22b   : > { %474 = vperm.xlu1 %789, %v793_v27  }
 0x2a7   : > { %v467_v30 = vpop.xlane.xlu1 %466 }
 0x2a8   : > { %v468_v31 = vadd.f32 %v467_v30, %v463_v29 }
 0x2aa   : > { %470 = vst.msk [vmem:[#allocation3] sm:$0xff] %vm382_vm2, %v468_v31 }
 0x2ab   : > { %v475_v35 = vpop.permute.xlu1 %474 }
 0x2ac   : > { %v477_v36 = vmul.f32 %v475_v35, %v471_v34 }
 0x2b1   : > { %v531_v32 = vld [vmem:[#allocation3] sm:$0xff] }
 0x2b2   : > { %794 = vrcp.f32 %v531_v32 }
 0x2bc   : > { %v795_v33 = vpop.eup %794 }
 0x2bd   : > { %536 = vperm.xlu1 %789, %v795_v33  }
 0x2ea   : > { %v519_v37 = vpop.f32.mrb[0].mxu1 }
 0x2eb   : > { %v525_v38 = vadd.f32 %v519_v37, %v477_v36  ;;  %v742_v39 = vpop.f32.mrb[1].mxu1 }
 0x2ec   : > { %v522_v40 = vpop.f32.mrb[2].mxu1 }
 0x2ed   : > { %526 = vst.msk [vmem:[#allocation4] sm:$0xff] %vm385_vm0, %v525_v38  ;;  %v743_v41 = vpop.f32.mrb[3].mxu1 }
 0x2f4   : > { %v533_v42 = vld [vmem:[#allocation4] sm:$0xff] }
 0x33c   : > { %v537_v43 = vpop.permute.xlu1 %536 }
 0x33d   : > { %v539_v44 = vmul.f32 %v537_v43, %v533_v42 }
 0x33f   : > { %v540_v45 = vpack.c.bf16 %v539_v44, %v539_v44 }
 0x341   : > { %542 = vst.msk [vmem:[%s376_s13] sm:$0xf] %vm541_vm4, %v540_v45 }
 0x342 PF: > { %s14_s19 = sadd.s32 1, %s834_s19   ;;  %s947_s15 = smov %s826_s17 }
 0x343   : > { %p11_p7 = scmp.ge.s32.totalorder %s14_s19, 10   ;;  %s948_s16 = smov %s830_s18 }
 0x344   : > { %s949_s17 = smov %s952_s20  ;;  %s950_s18 = smov %s956_s21 }
 0x345   :  { %13 = sbr.rel (!%p11_p7) target bundleno = 3 (0x3), region = 83 }

// kernel: bert_forward.13
= control target key start
LH: loop header
LB: loop body
LE: loop exit
PB: predicated region body
PF: predicated region fallthrough
CT: control target
= control target key end

     0   :  { %vm25_vm0 = vcmask 261120   ;;  %v213_v16 = vmov 0.0   ;;  %vm214_vm1 = vmmov 0   ;;  %s271_s0 = inlined_call_operand.vmem [shape: bf16[16,32], index: 0, kind: input, shape index: {}]   ;;  %s272_s1 = inlined_call_operand.vmem [shape: bf16[32,128], index: 1, kind: input, shape index: {}]   ;;  %s273_s3 = inlined_call_operand.vmem [shape: f32[1,32], index: 3, kind: input, shape index: {}]   ;;  %s274_s4 = inlined_call_operand.vmem [shape: f32[1,32], index: 4, kind: input, shape index: {}]   ;;  %s275_s2 = inlined_call_operand.vmem [shape: f32[1,128], index: 2, kind: input, shape index: {}]   ;;  %s276_s5 = inlined_call_operand.vmem [shape: bf16[16,128], index: 5, kind: output, shape index: {}]  }
   0x1   :  { %v182_v0 = vld [vmem:[%s271_s0] sm:$0xff]   ;;  %193 = vmatprep.subr.bf16.mxu0 %v213_v16  ;;  %v204_v17 = vld [vmem:[%s272_s1 + $0x8] sm:$0xff]   ;;  %197 = vmatprep.mubr.msk.bf16.mxu0 %vm214_vm1, %v213_v16 }
   0x2   :  { %v183_v1 = vunpack.c.l.bf16 %v182_v0  ;;  %v184_v2 = vunpack.c.h.bf16 %v182_v0  ;;  %v203_v15 = vld [vmem:[%s272_s1] sm:$0xff]  }
   0x3   :  { %194 = vmatpush3.bf16.msra.mxu0 %v203_v15  ;;  %v171_v26 = vld [vmem:[%s273_s3] ss:$0 sm:$0xff] }
   0x4   :  { %v26_v3 = vsel %vm25_vm0, %v183_v1, 0.0  ;;  %v29_v4 = vsel %vm25_vm0, %v184_v2, 0.0  ;;  %195 = vmatprep.subr.bf16.mxu0 %v213_v16  ;;  %v172_v30 = vld [vmem:[%s274_s4] ss:$0 sm:$0xff] }
   0x5   :  { %27 = vadd.xlane.f32.xlu0 %v26_v3  ;;  %v173_v35 = vld [vmem:[%s275_s2] ss:$0 sm:$0xff] }
   0x7   :  { %196 = vmatpush3.bf16.msra.mxu0 %v204_v17 }
   0x9   :  { %30 = vadd.xlane.f32.xlu0 %v29_v4 }
  0x92   :  { %v28_v5 = vpop.xlane.xlu0 %27 }
  0x93   :  { %v33_v6 = vmul.f32 0.03125, %v28_v5 }
  0x95   :  { %v35_v7 = vsub.f32 %v183_v1, %v33_v6 }
  0x96   :  { %v31_v8 = vpop.xlane.xlu0 %30 }
  0x97   :  { %v34_v9 = vmul.f32 0.03125, %v31_v8  ;;  %v37_v10 = vmul.f32 %v35_v7, %v35_v7 }
  0x99   :  { %v36_v11 = vsub.f32 %v184_v2, %v34_v9  ;;  %v39_v12 = vsel %vm25_vm0, %v37_v10, 0.0 }
  0x9a   :  { %40 = vadd.xlane.f32.xlu1 %v39_v12 }
  0x9b   :  { %v38_v13 = vmul.f32 %v36_v11, %v36_v11 }
  0x9d   :  { %v42_v14 = vsel %vm25_vm0, %v38_v13, 0.0 }
  0x9e   :  { %43 = vadd.xlane.f32.xlu1 %v42_v14 }
 0x127   :  { %v41_v18 = vpop.xlane.xlu1 %40 }
 0x128   :  { %v45_v19 = vmul.f32 0.03125, %v41_v18 }
 0x12a   :  { %v47_v20 = vadd.f32 1e-06, %v45_v19 }
 0x12b   :  { %v44_v21 = vpop.xlane.xlu1 %43 }
 0x12c   :  { %205 = vrsqrt.f32 %v47_v20  ;;  %v46_v22 = vmul.f32 0.03125, %v44_v21 }
 0x12e   :  { %v48_v23 = vadd.f32 1e-06, %v46_v22 }
 0x130   :  { %207 = vrsqrt.f32 %v48_v23 }
 0x136   :  { %v206_v24 = vpop.eup %205 }
 0x137   :  { %v51_v25 = vmul.f32 %v206_v24, %v35_v7 }
 0x139   :  { %v60_v29 = vmul.f32 %v171_v26, %v51_v25 }
 0x13a   :  { %v208_v27 = vpop.eup %207 }
 0x13b   :  { %v52_v28 = vmul.f32 %v208_v27, %v36_v11  ;;  %v69_v32 = vadd.f32 %v172_v30, %v60_v29 }
 0x13d   :  { %v61_v31 = vmul.f32 %v171_v26, %v52_v28 }
 0x13f   :  { %v70_v33 = vadd.f32 %v172_v30, %v61_v31 }
 0x141   :  { %v71_v34 = vpack.c.bf16 %v70_v33, %v69_v32 }
 0x143   :  { %198 = vmatmul.mubr.msk.bf16.vlgmr.msra.gmra.mrb[0].mxu0 %vm25_vm0, %v71_v34 }
 0x216   :  { %v132_v36 = vpop.f32.mrb[0].mxu0 }
 0x217   :  { %v133_v37 = vadd.f32 %v173_v35, %v132_v36  ;;  %v199_v38 = vpop.f32.mrb[1].mxu0 }
 0x218   :  { %v135_v39 = vpop.f32.mrb[2].mxu0 }
 0x219   :  { %v141_v40 = vmul.f32 %v133_v37, %v133_v37  ;;  %v136_v41 = vadd.f32 %v173_v35, %v135_v39  ;;  %v200_v42 = vpop.f32.mrb[3].mxu0  ;;  %v139_v55 = vmul.f32 0.5, %v133_v37 }
 0x21b   :  { %v143_v43 = vmul.f32 %v141_v40, %v133_v37  ;;  %v142_v44 = vmul.f32 %v136_v41, %v136_v41  ;;  %v140_v56 = vmul.f32 0.5, %v136_v41 }
 0x21d   :  { %v145_v45 = vmul.f32 0.044715, %v143_v43  ;;  %v144_v46 = vmul.f32 %v142_v44, %v136_v41 }
 0x21f   :  { %v147_v47 = vadd.f32 %v145_v45, %v133_v37  ;;  %v146_v48 = vmul.f32 0.044715, %v144_v46 }
 0x221   :  { %v149_v49 = vmul.f32 0.7978846, %v147_v47  ;;  %v148_v50 = vadd.f32 %v146_v48, %v136_v41 }
 0x223   :  { %209 = vtanh.f32 %v149_v49  ;;  %v150_v51 = vmul.f32 0.7978846, %v148_v50 }
 0x225   :  { %211 = vtanh.f32 %v150_v51 }
 0x22d   :  { %v210_v52 = vpop.eup %209 }
 0x22e   :  { %v153_v53 = vadd.f32 1.0, %v210_v52 }
 0x22f   :  { %v212_v54 = vpop.eup %211 }
 0x230   :  { %v154_v57 = vadd.f32 1.0, %v212_v54  ;;  %v155_v58 = vmul.f32 %v153_v53, %v139_v55 }
 0x232   :  { %v156_v59 = vmul.f32 %v154_v57, %v140_v56 }
 0x234   :  { %v188_v60 = vpack.c.bf16 %v156_v59, %v155_v58 }
 0x236   :  { %189 = vst [vmem:[%s276_s5] sm:$0xff] %v188_v60  }

// kernel: bert_forward.14
= control target key start
LH: loop header
LB: loop body
LE: loop exit
PB: predicated region body
PF: predicated region fallthrough
CT: control target
= control target key end

     0   :  { %v217_v0 = vmov 0.0   ;;  %vm218_vm0 = vmmov 0   ;;  %vm152_vm1 = vcmask 257024   ;;  %s283_s1 = inlined_call_operand.vmem [shape: bf16[128,32], index: 1, kind: input, shape index: {}]   ;;  %s284_s0 = inlined_call_operand.vmem [shape: bf16[16,128], index: 0, kind: input, shape index: {}]   ;;  %s285_s3 = inlined_call_operand.vmem [shape: bf16[16,32], index: 3, kind: input, shape index: {}]   ;;  %s286_s2 = inlined_call_operand.vmem [shape: f32[1,32], index: 2, kind: input, shape index: {}]   ;;  %s287_s4 = inlined_call_operand.vmem [shape: bf16[16,32], index: 4, kind: output, shape index: {}]  }
   0x1   :  { %186 = vmatprep.subr.bf16.mxu0 %v217_v0  ;;  %v208_v1 = vld [vmem:[%s283_s1] sm:$0xff]   ;;  %202 = vmatprep.mubr.msk.bf16.mxu0 %vm218_vm0, %v217_v0  ;;  %v209_v2 = vld [vmem:[%s283_s1 + $0x8] sm:$0xff]   ;;  %v210_v3 = vld [vmem:[%s283_s1 + $0x10] sm:$0xff]  }
   0x2   :  { %187 = vmatpush3.bf16.msra.mxu0 %v208_v1  ;;  %v211_v4 = vld [vmem:[%s283_s1 + $0x18] sm:$0xff]   ;;  %v212_v5 = vld [vmem:[%s283_s1 + $0x20] sm:$0xff]   ;;  %v213_v6 = vld [vmem:[%s283_s1 + $0x28] sm:$0xff]  }
   0x3   :  { %188 = vmatprep.subr.bf16.mxu0 %v217_v0  ;;  %v214_v7 = vld [vmem:[%s283_s1 + $0x30] sm:$0xff]   ;;  %v215_v8 = vld [vmem:[%s283_s1 + $0x38] sm:$0xff]   ;;  %v216_v9 = vld [vmem:[%s284_s0] sm:$0xff]  }
   0x4   :  { %v174_v10 = vld [vmem:[%s285_s3] sm:$0xff]  }
   0x5   :  { %v159_v11 = vld [vmem:[%s286_s2] ss:$0 sm:$0xff]  ;;  %v175_v12 = vunpack.c.l.bf16 %v174_v10  ;;  %v176_v16 = vunpack.c.h.bf16 %v174_v10 }
   0x6   :  { %189 = vmatpush3.bf16.msra.mxu0 %v209_v2 }
   0x7   :  { %190 = vmatprep.subr.bf16.mxu0 %v217_v0 }
   0xa   :  { %191 = vmatpush3.bf16.msra.mxu0 %v210_v3 }
   0xb   :  { %192 = vmatprep.subr.bf16.mxu0 %v217_v0 }
   0xe   :  { %193 = vmatpush3.bf16.msra.mxu0 %v211_v4 }
   0xf   :  { %194 = vmatprep.subr.bf16.mxu0 %v217_v0 }
  0x12   :  { %195 = vmatpush3.bf16.msra.mxu0 %v212_v5 }
  0x13   :  { %196 = vmatprep.subr.bf16.mxu0 %v217_v0 }
  0x16   :  { %197 = vmatpush3.bf16.msra.mxu0 %v213_v6 }
  0x17   :  { %198 = vmatprep.subr.bf16.mxu0 %v217_v0 }
  0x1a   :  { %199 = vmatpush3.bf16.msra.mxu0 %v214_v7 }
  0x1b   :  { %200 = vmatprep.subr.bf16.mxu0 %v217_v0 }
  0x1e   :  { %201 = vmatpush3.bf16.msra.mxu0 %v215_v8 }
  0x21   :  { %203 = vmatmul.mubr.bf16.vlgmr.msra.gmra.mrb[0].mxu0 %v216_v9 }
  0xf4   :  { %v131_v13 = vpop.f32.mrb[0].mxu0 }
  0xf5   :  { %v132_v14 = vadd.f32 %v159_v11, %v131_v13  ;;  %v204_v15 = vpop.f32.mrb[1].mxu0 }
  0xf6   :  { %v134_v17 = vpop.f32.mrb[2].mxu0 }
  0xf7   :  { %v142_v18 = vadd.f32 %v175_v12, %v132_v14  ;;  %v135_v19 = vadd.f32 %v159_v11, %v134_v17  ;;  %v205_v20 = vpop.f32.mrb[3].mxu0 }
  0xf9   :  { %v171_v21 = vpack.c.bf16 %v142_v18, %v142_v18  ;;  %v143_v22 = vadd.f32 %v176_v16, %v135_v19 }
  0xfb   :  { %153 = vst.msk [vmem:[%s287_s4] sm:$0xf] %vm152_vm1, %v171_v21  ;;  %v172_v23 = vpack.c.bf16 %v143_v22, %v143_v22 }
  0xfd   :  { %154 = vst.msk [vmem:[%s287_s4 + $0x4] sm:$0xf] %vm152_vm1, %v172_v23 }

</bundles_post_ra>
